<compile_context>
chip_gen: v7x
topology: tpu7x:2x2x1
jax: 0.10.0
libtpu: 0.0.40
codegen_flags: <defaults>
</compile_context>

<pallas_src>
import functools

import jax
import jax.numpy as jnp
from jax import lax
from jax.experimental import pallas as pl
from jax.experimental.pallas import tpu as pltpu


def _round_up(x, m):
    return ((x + m - 1) // m) * m


def _pick_tm(m, tm_max=512, tm_min=128):
    """Large row tile (mem-bound), but keep >= 2 grid blocks when the row
    count allows so the parallel grid axis can shard across v7x's 2 TCs."""
    half = _round_up((m + 1) // 2, tm_min)
    return max(tm_min, min(tm_max, half))


# ---------------------------------------------------------------------------
# Kernel 1: fused encoder + head  (x -> relu(x@We+be) -> {feature2d, sem2d})
# ---------------------------------------------------------------------------
def _encoder_head_kernel(x_ref, we_ref, be_ref, wf_ref, bf_ref, ws_ref, bs_ref,
                         feat_ref, sem_ref):
    # encoder: relu(x @ w_enc + b_enc)   -- stays in VMEM/vregs
    h = jnp.dot(x_ref[...], we_ref[...], preferred_element_type=jnp.float32)
    h = jnp.maximum(h + be_ref[...], 0.0)
    # head feature branch: relu(h @ w_hf + b_hf), stored bf16 (HBM stream)
    f = jnp.dot(h, wf_ref[...], preferred_element_type=jnp.float32)
    f = jnp.maximum(f + bf_ref[...], 0.0)
    feat_ref[...] = f.astype(feat_ref.dtype)
    # head semantic branch: h @ w_hs + b_hs  (f32 logits, model output)
    s = jnp.dot(h, ws_ref[...], preferred_element_type=jnp.float32)
    sem_ref[...] = s + bs_ref[...]


def encoder_head_2d(x, we, be, wf, bf, ws, bs, tm_max=512):
    """x: (M, Cin) f32 -> (feature2d (M, F) bf16, sem (M, NC) f32)."""
    M, Cin = x.shape
    F = we.shape[1]
    NC = ws.shape[1]
    tm = _pick_tm(M, tm_max)
    Mp = _round_up(M, tm)
    if Mp != M:
        x = jnp.pad(x, ((0, Mp - M), (0, 0)))
    feat, sem = pl.pallas_call(
        _encoder_head_kernel,
        out_shape=(jax.ShapeDtypeStruct((Mp, F), jnp.bfloat16),
                   jax.ShapeDtypeStruct((Mp, NC), jnp.float32)),
        grid_spec=pltpu.PrefetchScalarGridSpec(
            num_scalar_prefetch=0,
            grid=(Mp // tm,),
            in_specs=[
                pl.BlockSpec((tm, Cin), lambda i: (i, 0)),
                pl.BlockSpec((Cin, F), lambda i: (0, 0)),
                pl.BlockSpec((1, F), lambda i: (0, 0)),
                pl.BlockSpec((F, F), lambda i: (0, 0)),
                pl.BlockSpec((1, F), lambda i: (0, 0)),
                pl.BlockSpec((F, NC), lambda i: (0, 0)),
                pl.BlockSpec((1, NC), lambda i: (0, 0)),
            ],
            out_specs=[
                pl.BlockSpec((tm, F), lambda i: (i, 0)),
                pl.BlockSpec((tm, NC), lambda i: (i, 0)),
            ],
        ),
        compiler_params=pltpu.CompilerParams(
            dimension_semantics=("parallel",)),
    )(x, we, be, wf, bf, ws, bs)
    return feat[:M], sem[:M]


# ---------------------------------------------------------------------------
# Kernel 2: fused "complete" + TSDFNet + discriminator masked pool
#   per voxel-row tile:
#     tsdf_feat = relu(tsdf * w_ts + b_ts)            (VPU broadcast, K=1)
#     pred      = g2d @ w2d + tsdf_feat @ w_ct + b_c  (MXU)
#     acc      += lw^T @ pred                         (masked pool, MXU)
#   last tile per batch: logit = sum(acc/Nvox * w_d) + b_d
# ---------------------------------------------------------------------------
def _complete_disc_kernel(g_ref, ts_ref, lw_ref, w2d_ref, wts_ref, bts_ref,
                          wct_ref, bc_ref, wd_ref, bd_ref,
                          pred_ref, logit_ref, acc_ref, *, inv_nvox):
    i = pl.program_id(1)

    @pl.when(i == 0)
    def _init():
        acc_ref[...] = jnp.zeros_like(acc_ref)

    # TSDFNet: relu(tsdf * w_ts + b_ts)  -- (tm,1)*(1,C3) broadcast on the VPU
    tf = jnp.maximum(ts_ref[0] * wts_ref[...] + bts_ref[...], 0.0)      # (tm, C3)

    # complete projection (bf16 gathered feats, f32 accumulation)
    y = jnp.dot(g_ref[0], w2d_ref[...], preferred_element_type=jnp.float32)
    y = y + jnp.dot(tf, wct_ref[...], preferred_element_type=jnp.float32)
    pred = y + bc_ref[...]                                              # (tm, NC)
    pred_ref[0] = pred

    # disc masked-sum: lw^T @ pred  (padded rows have lw == 0)
    contrib = lax.dot_general(
        lw_ref[0], pred,
        dimension_numbers=(((0,), (0,)), ((), ())),
        preferred_element_type=jnp.float32)                             # (1, NC)
    acc_ref[...] += contrib

    @pl.when(i == pl.num_programs(1) - 1)
    def _finalize():
        pooled = acc_ref[...] * inv_nvox                                # (1, NC)
        logit = jnp.sum(pooled * wd_ref[...], axis=-1, keepdims=True)
        logit_ref[0] = logit + bd_ref[...]


def complete_disc(gathered, tsdf_rows, lw, w2d, wts, bts, wct, bc, wd, bd,
                  tm_max=512):
    """gathered: (B, Nvox, C2) bf16, tsdf_rows/lw: (B, Nvox, 1) f32.
    Returns (pred (B, Nvox, NC) f32, disc logits (B, 1) f32)."""
    B, Nvox, C2 = gathered.shape
    C3 = wts.shape[1]
    NC = w2d.shape[1]
    tm = min(tm_max, _round_up(Nvox, 128))
    Np = _round_up(Nvox, tm)
    if Np != Nvox:
        pad = ((0, 0), (0, Np - Nvox), (0, 0))
        gathered = jnp.pad(gathered, pad)
        tsdf_rows = jnp.pad(tsdf_rows, pad)
        lw = jnp.pad(lw, pad)   # zero weights -> padded rows don't pollute acc

    kernel = functools.partial(_complete_disc_kernel, inv_nvox=1.0 / Nvox)
    pred, logit = pl.pallas_call(
        kernel,
        out_shape=(jax.ShapeDtypeStruct((B, Np, NC), jnp.float32),
                   jax.ShapeDtypeStruct((B, 1, 1), jnp.float32)),
        grid_spec=pltpu.PrefetchScalarGridSpec(
            num_scalar_prefetch=0,
            grid=(B, Np // tm),
            in_specs=[
                pl.BlockSpec((1, tm, C2), lambda b, i: (b, i, 0)),
                pl.BlockSpec((1, tm, 1), lambda b, i: (b, i, 0)),
                pl.BlockSpec((1, tm, 1), lambda b, i: (b, i, 0)),
                pl.BlockSpec((C2, NC), lambda b, i: (0, 0)),
                pl.BlockSpec((1, C3), lambda b, i: (0, 0)),
                pl.BlockSpec((1, C3), lambda b, i: (0, 0)),
                pl.BlockSpec((C3, NC), lambda b, i: (0, 0)),
                pl.BlockSpec((1, NC), lambda b, i: (0, 0)),
                pl.BlockSpec((1, NC), lambda b, i: (0, 0)),
                pl.BlockSpec((1, 1), lambda b, i: (0, 0)),
            ],
            out_specs=[
                pl.BlockSpec((1, tm, NC), lambda b, i: (b, i, 0)),
                pl.BlockSpec((1, 1, 1), lambda b, i: (b, 0, 0)),
            ],
            scratch_shapes=[pltpu.VMEM((1, NC), jnp.float32)],
        ),
        compiler_params=pltpu.CompilerParams(
            dimension_semantics=("parallel", "arbitrary")),
    )(gathered, tsdf_rows, lw, w2d, wts, bts, wct, bc, wd, bd)
    return pred[:, :Nvox], logit.reshape(B, 1)


# ---------------------------------------------------------------------------
# VoxelSSC (synthetic, deterministic weights)
# ---------------------------------------------------------------------------
class VoxelSSCPallas:
    def __init__(self, key, in_ch=3, feat_ch=32, tsdf_ch=16, num_classes=12):
        ks = jax.random.split(key, 8)
        s = 0.1
        self.num_classes = num_classes
        self.feat_ch = feat_ch
        # encoder
        self.w_enc = s * jax.random.normal(ks[0], (in_ch, feat_ch), jnp.float32)
        self.b_enc = jnp.zeros((1, feat_ch), jnp.float32)
        # head (feature branch + semantic branch)
        self.w_hf = s * jax.random.normal(ks[1], (feat_ch, feat_ch), jnp.float32)
        self.b_hf = jnp.zeros((1, feat_ch), jnp.float32)
        self.w_hs = s * jax.random.normal(ks[2], (feat_ch, num_classes), jnp.float32)
        self.b_hs = jnp.zeros((1, num_classes), jnp.float32)
        # TSDFNet
        self.w_ts = s * jax.random.normal(ks[3], (1, tsdf_ch), jnp.float32)
        self.b_ts = jnp.zeros((1, tsdf_ch), jnp.float32)
        # complete
        self.w_c2d = s * jax.random.normal(ks[4], (feat_ch, num_classes), jnp.float32)
        self.w_ct = s * jax.random.normal(ks[5], (tsdf_ch, num_classes), jnp.float32)
        self.b_c = jnp.zeros((1, num_classes), jnp.float32)
        # disc
        self.w_d = s * jax.random.normal(ks[6], (1, num_classes), jnp.float32)
        self.b_d = jnp.zeros((1, 1), jnp.float32)

    def forward(self, img, mapping2d, tsdf, label_weight, training=True):
        B, Cin, H, W = img.shape
        NC = self.num_classes
        F = self.feat_ch

        # ----- fused encoder + head (single Pallas pass over B*H*W rows) -----
        x2d = jnp.transpose(img, (0, 2, 3, 1)).reshape(B * H * W, Cin)
        feature2d, sem = encoder_head_2d(
            x2d, self.w_enc, self.b_enc, self.w_hf, self.b_hf,
            self.w_hs, self.b_hs)
        # semantic2d already at img_size (stride-1 synthetic encoder), NCHW out
        semantic2d = jnp.transpose(sem.reshape(B, H, W, NC), (0, 3, 1, 2))

        # ----- 2D -> 3D lift via mapping2d -----
        _, _, h3, w3, d3 = tsdf.shape
        Nvox = h3 * w3 * d3
        feat2d_b = feature2d.reshape(B, H * W, F)          # bf16 intermediate
        # TODO(synk): data-dependent gather kept in XLA; could be fused into the
        # complete kernel via scalar-prefetched mapping2d when the per-batch
        # feature map fits VMEM.  Out-of-range indices are clamped by XLA gather.
        gathered = jnp.take_along_axis(
            feat2d_b, mapping2d[..., None].astype(jnp.int32), axis=1)  # (B,Nvox,F)

        tsdf_rows = jnp.transpose(tsdf, (0, 2, 3, 4, 1)).reshape(B, Nvox, 1)
        lw = label_weight.reshape(B, Nvox, 1).astype(jnp.float32)

        # ----- fused TSDFNet + complete + disc masked pool -----
        pred, logit = complete_disc(
            gathered, tsdf_rows, lw,
            self.w_c2d.astype(jnp.bfloat16), self.w_ts, self.b_ts,
            self.w_ct, self.b_c, self.w_d, self.b_d)

        pred3d = jnp.transpose(pred.reshape(B, h3, w3, d3, NC), (0, 4, 1, 2, 3))
        aug_info = None  # augmentation bookkeeping from `complete` (not modeled)

        fake_loss = None
        if training:
            # BCEWithLogitsLoss(logits, ones) = mean(softplus(-logits))
            fake_loss = jnp.mean(jax.nn.softplus(-logit))

        return pred3d, semantic2d, aug_info, fake_loss


if __name__ == "__main__":
    key = jax.random.PRNGKey(0)
    k_img, k_tsdf, k_map, k_lw, k_param = jax.random.split(key, 5)

    B, H, W = 2, 16, 16
    h3, w3, d3 = 8, 8, 4
    Nvox = h3 * w3 * d3

    img = jax.random.normal(k_img, (B, 3, H, W), jnp.float32)
    tsdf = jax.random.normal(k_tsdf, (B, 1, h3, w3, d3), jnp.float32)
    mapping2d = jax.random.randint(k_map, (B, Nvox), 0, H * W, jnp.int32)
    label_weight = (jax.random.uniform(k_lw, (B, h3, w3, d3)) > 0.3).astype(jnp.float32)

    model = VoxelSSCPallas(k_param)
    pred3d, semantic2d, aug_info, fake_loss = model.forward(
        img, mapping2d, tsdf, label_weight, training=True)

    jax.block_until_ready((pred3d, semantic2d, fake_loss))
    assert pred3d.shape == (B, 12, h3, w3, d3)
    assert semantic2d.shape == (B, 12, H, W)
    assert fake_loss.shape == ()
    print("KERNEL_OK")
</pallas_src>

<mosaic_0001>
module attributes {stable_mosaic.version = 11 : i64} {
  func.func @_encoder_head_kernel(%arg0: i32, %arg1: memref<256x3xf32, #tpu.memory_space<vmem>>, %arg2: memref<3x32xf32, #tpu.memory_space<vmem>>, %arg3: memref<1x32xf32, #tpu.memory_space<vmem>>, %arg4: memref<32x32xf32, #tpu.memory_space<vmem>>, %arg5: memref<1x32xf32, #tpu.memory_space<vmem>>, %arg6: memref<32x12xf32, #tpu.memory_space<vmem>>, %arg7: memref<1x12xf32, #tpu.memory_space<vmem>>, %arg8: memref<256x32xbf16, #tpu.memory_space<vmem>>, %arg9: memref<256x12xf32, #tpu.memory_space<vmem>>) attributes {dimension_semantics = [#tpu.dimension_semantics<parallel>], iteration_bounds = array<i64: 2>, scalar_prefetch = 0 : i64, scratch_operands = 0 : i64, tpu.core_type = #tpu.core_type<tc>, window_params = [{transform_indices = @transform_0, window_bounds = array<i64: 256, 3>}, {pipeline_mode = #tpu.pipeline_mode<synchronous>, transform_indices = @transform_1, window_bounds = array<i64: 3, 32>}, {pipeline_mode = #tpu.pipeline_mode<synchronous>, transform_indices = @transform_2, window_bounds = array<i64: 1, 32>}, {pipeline_mode = #tpu.pipeline_mode<synchronous>, transform_indices = @transform_3, window_bounds = array<i64: 32, 32>}, {pipeline_mode = #tpu.pipeline_mode<synchronous>, transform_indices = @transform_4, window_bounds = array<i64: 1, 32>}, {pipeline_mode = #tpu.pipeline_mode<synchronous>, transform_indices = @transform_5, window_bounds = array<i64: 32, 12>}, {pipeline_mode = #tpu.pipeline_mode<synchronous>, transform_indices = @transform_6, window_bounds = array<i64: 1, 12>}, {transform_indices = @transform_7, window_bounds = array<i64: 256, 32>}, {transform_indices = @transform_8, window_bounds = array<i64: 256, 12>}]} {
    %c0 = arith.constant 0 : index
    %c0_0 = arith.constant 0 : index
    %0 = vector.load %arg1[%c0, %c0_0] : memref<256x3xf32, #tpu.memory_space<vmem>>, vector<256x3xf32>
    %c0_1 = arith.constant 0 : index
    %c0_2 = arith.constant 0 : index
    %1 = vector.load %arg2[%c0_1, %c0_2] : memref<3x32xf32, #tpu.memory_space<vmem>>, vector<3x32xf32>
    %cst = arith.constant dense<0.000000e+00> : vector<256x32xf32>
    %2 = tpu.matmul %0, %1, %cst {dimension_numbers = #tpu.dot_dimension_numbers<[1], [0], [0], [1], [0, 0, 1, 1], [], []>} : vector<256x3xf32>, vector<3x32xf32>, vector<256x32xf32> -> vector<256x32xf32>
    %c0_3 = arith.constant 0 : index
    %c0_4 = arith.constant 0 : index
    %3 = vector.load %arg3[%c0_3, %c0_4] : memref<1x32xf32, #tpu.memory_space<vmem>>, vector<1x32xf32>
    %4 = vector.broadcast %3 : vector<1x32xf32> to vector<256x32xf32>
    %5 = arith.addf %2, %4 : vector<256x32xf32>
    %cst_5 = arith.constant 0.000000e+00 : f32
    %6 = vector.broadcast %cst_5 : f32 to vector<256x32xf32>
    %7 = arith.maximumf %5, %6 : vector<256x32xf32>
    %c0_6 = arith.constant 0 : index
    %c0_7 = arith.constant 0 : index
    %8 = vector.load %arg4[%c0_6, %c0_7] : memref<32x32xf32, #tpu.memory_space<vmem>>, vector<32x32xf32>
    %cst_8 = arith.constant dense<0.000000e+00> : vector<256x32xf32>
    %9 = tpu.matmul %7, %8, %cst_8 {dimension_numbers = #tpu.dot_dimension_numbers<[1], [0], [0], [1], [0, 0, 1, 1], [], []>} : vector<256x32xf32>, vector<32x32xf32>, vector<256x32xf32> -> vector<256x32xf32>
    %c0_9 = arith.constant 0 : index
    %c0_10 = arith.constant 0 : index
    %10 = vector.load %arg5[%c0_9, %c0_10] : memref<1x32xf32, #tpu.memory_space<vmem>>, vector<1x32xf32>
    %11 = vector.broadcast %10 : vector<1x32xf32> to vector<256x32xf32>
    %12 = arith.addf %9, %11 : vector<256x32xf32>
    %cst_11 = arith.constant 0.000000e+00 : f32
    %13 = vector.broadcast %cst_11 : f32 to vector<256x32xf32>
    %14 = arith.maximumf %12, %13 : vector<256x32xf32>
    %15 = arith.truncf %14 : vector<256x32xf32> to vector<256x32xbf16>
    %c0_12 = arith.constant 0 : index
    %c0_13 = arith.constant 0 : index
    %16 = vector.load %arg8[%c0_12, %c0_13] : memref<256x32xbf16, #tpu.memory_space<vmem>>, vector<256x32xbf16>
    tpu.vector_store %arg8[%c0_12, %c0_13], %15 {strides = array<i32>} : memref<256x32xbf16, #tpu.memory_space<vmem>>, vector<256x32xbf16>,
    %c0_14 = arith.constant 0 : index
    %c0_15 = arith.constant 0 : index
    %17 = vector.load %arg6[%c0_14, %c0_15] : memref<32x12xf32, #tpu.memory_space<vmem>>, vector<32x12xf32>
    %cst_16 = arith.constant dense<0.000000e+00> : vector<256x12xf32>
    %18 = tpu.matmul %7, %17, %cst_16 {dimension_numbers = #tpu.dot_dimension_numbers<[1], [0], [0], [1], [0, 0, 1, 1], [], []>} : vector<256x32xf32>, vector<32x12xf32>, vector<256x12xf32> -> vector<256x12xf32>
    %c0_17 = arith.constant 0 : index
    %c0_18 = arith.constant 0 : index
    %19 = vector.load %arg7[%c0_17, %c0_18] : memref<1x12xf32, #tpu.memory_space<vmem>>, vector<1x12xf32>
    %20 = vector.broadcast %19 : vector<1x12xf32> to vector<256x12xf32>
    %21 = arith.addf %18, %20 : vector<256x12xf32>
    %c0_19 = arith.constant 0 : index
    %c0_20 = arith.constant 0 : index
    %22 = vector.load %arg9[%c0_19, %c0_20] : memref<256x12xf32, #tpu.memory_space<vmem>>, vector<256x12xf32>
    tpu.vector_store %arg9[%c0_19, %c0_20], %21 {strides = array<i32>} : memref<256x12xf32, #tpu.memory_space<vmem>>, vector<256x12xf32>,
    return
  }
  func.func @transform_0(%arg0: i32) -> (i32, i32) {
    %c0_i32 = arith.constant 0 : i32
    %c0_i32_0 = arith.constant 0 : i32
    return %arg0, %c0_i32 : i32, i32
  }
  func.func @transform_1(%arg0: i32) -> (i32, i32) {
    %c0_i32 = arith.constant 0 : i32
    %c0_i32_0 = arith.constant 0 : i32
    %c0_i32_1 = arith.constant 0 : i32
    return %c0_i32, %c0_i32_0 : i32, i32
  }
  func.func @transform_2(%arg0: i32) -> (i32, i32) {
    %c0_i32 = arith.constant 0 : i32
    %c0_i32_0 = arith.constant 0 : i32
    %c0_i32_1 = arith.constant 0 : i32
    return %c0_i32, %c0_i32_0 : i32, i32
  }
  func.func @transform_3(%arg0: i32) -> (i32, i32) {
    %c0_i32 = arith.constant 0 : i32
    %c0_i32_0 = arith.constant 0 : i32
    %c0_i32_1 = arith.constant 0 : i32
    return %c0_i32, %c0_i32_0 : i32, i32
  }
  func.func @transform_4(%arg0: i32) -> (i32, i32) {
    %c0_i32 = arith.constant 0 : i32
    %c0_i32_0 = arith.constant 0 : i32
    %c0_i32_1 = arith.constant 0 : i32
    return %c0_i32, %c0_i32_0 : i32, i32
  }
  func.func @transform_5(%arg0: i32) -> (i32, i32) {
    %c0_i32 = arith.constant 0 : i32
    %c0_i32_0 = arith.constant 0 : i32
    %c0_i32_1 = arith.constant 0 : i32
    return %c0_i32, %c0_i32_0 : i32, i32
  }
  func.func @transform_6(%arg0: i32) -> (i32, i32) {
    %c0_i32 = arith.constant 0 : i32
    %c0_i32_0 = arith.constant 0 : i32
    %c0_i32_1 = arith.constant 0 : i32
    return %c0_i32, %c0_i32_0 : i32, i32
  }
  func.func @transform_7(%arg0: i32) -> (i32, i32) {
    %c0_i32 = arith.constant 0 : i32
    %c0_i32_0 = arith.constant 0 : i32
    return %arg0, %c0_i32 : i32, i32
  }
  func.func @transform_8(%arg0: i32) -> (i32, i32) {
    %c0_i32 = arith.constant 0 : i32
    %c0_i32_0 = arith.constant 0 : i32
    return %arg0, %c0_i32 : i32, i32
  }
}

</mosaic_0001>

<bundles_post_ra>
// kernel: tpu_custom_call.1
= control target key start
LH: loop header
LB: loop body
LE: loop exit
PB: predicated region body
PF: predicated region fallthrough
CT: control target
= control target key end

     0   :  { %s2129_s27 = smov 0   ;;  %s2587_s0 = inlined_call_operand.vmem [shape: f32[512,3], index: 0, kind: input, shape index: {}]   ;;  %s2588_s1 = inlined_call_operand.vmem [shape: f32[3,32], index: 1, kind: input, shape index: {}]   ;;  %s2589_s2 = inlined_call_operand.vmem [shape: f32[1,32], index: 2, kind: input, shape index: {}]   ;;  %s2590_s3 = inlined_call_operand.vmem [shape: f32[32,32], index: 3, kind: input, shape index: {}]   ;;  %s2591_s4 = inlined_call_operand.vmem [shape: f32[1,32], index: 4, kind: input, shape index: {}]   ;;  %s2592_s5 = inlined_call_operand.vmem [shape: f32[32,12], index: 5, kind: input, shape index: {}]   ;;  %s2593_s6 = inlined_call_operand.vmem [shape: f32[1,12], index: 6, kind: input, shape index: {}]   ;;  %s2594_s7 = inlined_call_operand.vmem [shape: bf16[512,32], index: 7, kind: output, shape index: {0}]   ;;  %s2595_s8 = inlined_call_operand.vmem [shape: f32[512,12], index: 8, kind: output, shape index: {1}]  }
   0x1 LB: > { %s1606_s28 = sadd.s32 4294967295, %s2082_s27   ;;  %p1610_p0 = scmp.ge.s32.totalorder %s2082_s27, 1  ;;  %s2082_s27 = sphi %s2129_s27, %s19_s27  }
   0x2   : > { %p266_p1 = scmp.lt.s32.totalorder %s2082_s27, 3 }
   0x4   : > { %p267_p2 = pnand %p1610_p0, %p266_p1 }
   0x5   : > { %v355_v0 = vld [vmem:[%s2588_s1] sm:$0x7] (!%p267_p2)  ;;  %vm460_vm0 = vcmask (!%p267_p2), 1042432   ;;  %s1611_s9 = sshll.u32 (!%p267_p2), %s1606_s28, 5  ;;  %v722_v2 = vld [vmem:[%s2590_s3 + $0x8] sm:$0xff] (!%p267_p2)  ;;  %v1249_v7 = vld [vmem:[%s2592_s5 + $0x10] sm:$0xff] (!%p267_p2) }
   0x6   : > { %270 = sbr.rel (%p267_p2) target bundleno = 516 (0x204), region = 48  ;;  %v721_v1 = vld [vmem:[%s2590_s3] sm:$0xff] (!%p267_p2)  ;;  %1888 = vmatprep.subr.msk.mxu0 (!%p267_p2), %vm460_vm0, %v355_v0  ;;  %p306_p3 = scmp.lt.s32.totalorder (!%p267_p2), %s1611_s9, 63  ;;  %2066 = vmatprep.subr.msk.mxu1 (!%p267_p2), %vm460_vm0, %v355_v0  ;;  %v1248_v4 = vld [vmem:[%s2592_s5 + $0x8] sm:$0xff] (!%p267_p2)  ;;  %v1250_v8 = vld [vmem:[%s2592_s5 + $0x18] sm:$0xff] (!%p267_p2)  ;;  %vm363_vm1 = vcmask (!%p267_p2), 23552  }
   0x7   : > { %v1247_v3 = vld [vmem:[%s2592_s5] sm:$0xff] (!%p267_p2)  ;;  %1889 = vmatpush3.msk.msra.mxu0 (!%p267_p2), %vm460_vm0, %v355_v0  ;;  %2067 = vmatpush3.msk.msra.mxu1 (!%p267_p2), %vm460_vm0, %v355_v0  ;;  %v2050_v5 = vpack.c.bf16 (!%p267_p2), %v722_v2, %v721_v1  ;;  %v2062_v12 = vpack.c.bf16 (!%p267_p2), %v1250_v8, %v1249_v7  ;;  %v723_v13 = vld [vmem:[%s2590_s3 + $0x10] sm:$0xff] (!%p267_p2)  ;;  %v724_v14 = vld [vmem:[%s2590_s3 + $0x18] sm:$0xff] (!%p267_p2)  ;;  %vm732_vm2 = vcmask (!%p267_p2), 261120   ;;  %vm1483_vm3 = vcmask (!%p267_p2), 97280  }
   0x8   : > { %v2058_v6 = vpack.c.bf16 (!%p267_p2), %v1248_v4, %v1247_v3  ;;  %v2054_v19 = vpack.c.bf16 (!%p267_p2), %v724_v14, %v723_v13  ;;  %v2241_v45 = vld [vmem:[%s2589_s2] ss:$0 sm:$0xff] (!%p267_p2)  ;;  %vm1214_vm4 = vcmask (!%p267_p2), 257024  }
   0x9   : > { %2051 = vmatprep.subr.bf16.mxu1 (!%p267_p2), %v2050_v5 }
   0xa   : > { %2059 = vmatprep.subr.bf16.mxu0 (!%p267_p2), %v2058_v6 }
   0xd   : > { %s2597_s9 = smov (!%p306_p3, %s1611_s9), 63 }
   0xe   : > { %s1612_s22 = sshll.u32 %s2597_s9, 3  ;;  %s1614_s19 = sshll.u32 %s2597_s9, 2 }
   0xf   : > { %s2166_s25 = scalar_lea.vmem %s2587_s0, %s1612_s22  ;;  %s2384_s18 = scalar_lea.vmem %s2595_s8, %s1612_s22 }
  0x10   : > { %v323_v9 = vld [vmem:[%s2166_s25] sm:$0xff]  ;;  %v324_v10 = vld [vmem:[%s2166_s25 + $0x8] sm:$0xff]  ;;  %v325_v11 = vld [vmem:[%s2166_s25 + $0x10] sm:$0xff]  ;;  %s2396_s22 = scalar_lea.vmem %s2594_s7, %s1614_s19 }
  0x11   : > { %1890 = vmatprep.mubr.msk.f32.mxu0 %vm363_vm1, %v323_v9  ;;  %v326_v15 = vld [vmem:[%s2166_s25 + $0x18] sm:$0xff]  ;;  %v327_v16 = vld [vmem:[%s2166_s25 + $0x20] sm:$0xff]  ;;  %v340_v18 = vld [vmem:[%s2166_s25 + $0x88] sm:$0xff] }
  0x12   : > { %1891 = vmatmul.mubr.msk.f32.vlgmr.msra.gmra.mrb[0].mxu0 %vm363_vm1, %v324_v10  ;;  %v339_v17 = vld [vmem:[%s2166_s25 + $0x80] sm:$0xff]  ;;  %v341_v20 = vld [vmem:[%s2166_s25 + $0x90] sm:$0xff]  ;;  %v328_v21 = vld [vmem:[%s2166_s25 + $0x28] sm:$0xff] }
  0x13   : > { %1893 = vmatprep.mubr.msk.f32.mxu0 %vm363_vm1, %v325_v11  ;;  %2061 = vmatpush3.bf16.msra.mxu0 %v2058_v6  ;;  %v329_v22 = vld [vmem:[%s2166_s25 + $0x30] sm:$0xff]  ;;  %v342_v23 = vld [vmem:[%s2166_s25 + $0x98] sm:$0xff]  ;;  %v343_v24 = vld [vmem:[%s2166_s25 + $0xa0] sm:$0xff] }
  0x14   : > { %2063 = vmatprep.subr.bf16.mxu0 %v2062_v12  ;;  %1914 = vmatprep.mubr.msk.f32.mxu1 %vm363_vm1, %v339_v17  ;;  %v330_v25 = vld [vmem:[%s2166_s25 + $0x38] sm:$0xff]  ;;  %v331_v26 = vld [vmem:[%s2166_s25 + $0x40] sm:$0xff]  ;;  %v344_v27 = vld [vmem:[%s2166_s25 + $0xa8] sm:$0xff] }
  0x15   : > { %1915 = vmatmul.mubr.msk.f32.vlgmr.msra.gmra.mrb[0].mxu1 %vm363_vm1, %v340_v18  ;;  %v345_v28 = vld [vmem:[%s2166_s25 + $0xb0] sm:$0xff]  ;;  %v332_v29 = vld [vmem:[%s2166_s25 + $0x48] sm:$0xff]  ;;  %v346_v31 = vld [vmem:[%s2166_s25 + $0xb8] sm:$0xff] }
  0x16   : > { %1894 = vmatmul.mubr.msk.f32.gmra.mrb[2].mxu0 %vm363_vm1, %v326_v15  ;;  %1917 = vmatprep.mubr.msk.f32.mxu1 %vm363_vm1, %v341_v20  ;;  %v333_v30 = vld [vmem:[%s2166_s25 + $0x50] sm:$0xff]  ;;  %v347_v32 = vld [vmem:[%s2166_s25 + $0xc0] sm:$0xff]  ;;  %v334_v33 = vld [vmem:[%s2166_s25 + $0x58] sm:$0xff] }
  0x17   : > { %1896 = vmatprep.mubr.msk.f32.mxu0 %vm363_vm1, %v327_v16  ;;  %2053 = vmatpush3.bf16.msra.mxu1 %v2050_v5  ;;  %v335_v34 = vld [vmem:[%s2166_s25 + $0x60] sm:$0xff]  ;;  %v348_v35 = vld [vmem:[%s2166_s25 + $0xc8] sm:$0xff]  ;;  %v349_v36 = vld [vmem:[%s2166_s25 + $0xd0] sm:$0xff] }
  0x18   : > { %2055 = vmatprep.subr.bf16.mxu1 %v2054_v19  ;;  %2065 = vmatpush3.bf16.msra.mxu0 %v2062_v12  ;;  %v336_v37 = vld [vmem:[%s2166_s25 + $0x68] sm:$0xff]  ;;  %v337_v38 = vld [vmem:[%s2166_s25 + $0x70] sm:$0xff]  ;;  %v350_v39 = vld [vmem:[%s2166_s25 + $0xd8] sm:$0xff] }
  0x19   : > { %1918 = vmatmul.mubr.msk.f32.gmra.mrb[2].mxu1 %vm363_vm1, %v342_v23  ;;  %v351_v40 = vld [vmem:[%s2166_s25 + $0xe0] sm:$0xff]  ;;  %v338_v41 = vld [vmem:[%s2166_s25 + $0x78] sm:$0xff]  ;;  %v352_v42 = vld [vmem:[%s2166_s25 + $0xe8] sm:$0xff] }
  0x1a   : > { %1897 = vmatmul.mubr.msk.f32.gmra.mrb[4].mxu0 %vm363_vm1, %v328_v21  ;;  %1920 = vmatprep.mubr.msk.f32.mxu1 %vm363_vm1, %v343_v24  ;;  %v353_v43 = vld [vmem:[%s2166_s25 + $0xf0] sm:$0xff]  ;;  %v354_v44 = vld [vmem:[%s2166_s25 + $0xf8] sm:$0xff] }
  0x1b   : > { %1899 = vmatprep.mubr.msk.f32.mxu0 %vm363_vm1, %v329_v22  ;;  %2057 = vmatpush3.bf16.msra.mxu1 %v2054_v19 }
  0x1d   : > { %1921 = vmatmul.mubr.msk.f32.gmra.mrb[4].mxu1 %vm363_vm1, %v344_v27 }
  0x1e   : > { %1900 = vmatmul.mubr.msk.f32.gmra.mrb[6].mxu0 %vm363_vm1, %v330_v25  ;;  %1923 = vmatprep.mubr.msk.f32.mxu1 %vm363_vm1, %v345_v28 }
  0x1f   : > { %1902 = vmatprep.mubr.msk.f32.mxu0 %vm363_vm1, %v331_v26 }
  0x21   : > { %1924 = vmatmul.mubr.msk.f32.gmra.mrb[6].mxu1 %vm363_vm1, %v346_v31 }
  0x22   : > { %1903 = vmatmul.mubr.msk.f32.gmra.mrb[8].mxu0 %vm363_vm1, %v332_v29  ;;  %1926 = vmatprep.mubr.msk.f32.mxu1 %vm363_vm1, %v347_v32 }
  0x23   : > { %1905 = vmatprep.mubr.msk.f32.mxu0 %vm363_vm1, %v333_v30 }
  0x25   : > { %1927 = vmatmul.mubr.msk.f32.gmra.mrb[8].mxu1 %vm363_vm1, %v348_v35 }
  0x26   : > { %1906 = vmatmul.mubr.msk.f32.gmra.mrb[10].mxu0 %vm363_vm1, %v334_v33  ;;  %1929 = vmatprep.mubr.msk.f32.mxu1 %vm363_vm1, %v349_v36 }
  0x27   : > { %1908 = vmatprep.mubr.msk.f32.mxu0 %vm363_vm1, %v335_v34 }
  0x29   : > { %1930 = vmatmul.mubr.msk.f32.gmra.mrb[10].mxu1 %vm363_vm1, %v350_v39 }
  0x2a   : > { %1909 = vmatmul.mubr.msk.f32.gmra.mrb[12].mxu0 %vm363_vm1, %v336_v37  ;;  %1932 = vmatprep.mubr.msk.f32.mxu1 %vm363_vm1, %v351_v40 }
  0x2b   : > { %1911 = vmatprep.mubr.msk.f32.mxu0 %vm363_vm1, %v337_v38 }
  0x2d   : > { %1933 = vmatmul.mubr.msk.f32.gmra.mrb[12].mxu1 %vm363_vm1, %v352_v42 }
  0x2e   : > { %1912 = vmatmul.mubr.msk.f32.gmra.mrb[14].mxu0 %vm363_vm1, %v338_v41  ;;  %1935 = vmatprep.mubr.msk.f32.mxu1 %vm363_vm1, %v353_v43 }
  0x31   : > { %1936 = vmatmul.mubr.msk.f32.gmra.mrb[14].mxu1 %vm363_vm1, %v354_v44 }
  0xe5   : > { %v1892_v46 = vpop.f32.mrb[0].mxu0 }
  0xe6   : > { %v536_v47 = vadd.f32 %v1892_v46, %v2241_v45  ;;  %v530_v48 = vpop.f32.mrb[1].mxu0 }
  0xe7   : > { %v531_v49 = vadd.f32 %v2241_v45, %v530_v48 }
  0xe8   : > { %v690_v52 = vmax.f32 %v536_v47, 0.0  ;;  %v2246_v55 = vpop.f32.mrb[0].mxu1 }
  0xe9   : > { %v689_v50 = vmax.f32 %v531_v49, 0.0  ;;  %v1895_v51 = vpop.f32.mrb[2].mxu0  ;;  %v2251_v57 = vpop.f32.mrb[1].mxu1  ;;  %v616_v48 = vadd.f32 %v2246_v55, %v2241_v45 }
  0xea   : > { %v546_v53 = vadd.f32 %v1895_v51, %v2241_v45  ;;  %v540_v54 = vpop.f32.mrb[3].mxu0  ;;  %v611_v36 = vadd.f32 %v2241_v45, %v2251_v57 }
  0xeb   : > { %v541_v56 = vadd.f32 %v2241_v45, %v540_v54  ;;  %1946 = vmatprep.mubr.msk.f32.mxu1 %vm732_vm2, %v689_v50  ;;  %2002 = vmatprep.mubr.msk.f32.mxu0 %vm732_vm2, %v689_v50 }
  0xec   : > { %1947 = vmatmul.mubr.msk.f32.vlgmr.msra.gmra.mrb[16].mxu1 %vm732_vm2, %v690_v52  ;;  %2003 = vmatmul.mubr.msk.f32.vlgmr.msra.gmra.mrb[16].mxu0 %vm732_vm2, %v690_v52  ;;  %v692_v60 = vmax.f32 %v546_v53, 0.0  ;;  %v2256_v63 = vpop.f32.mrb[2].mxu1  ;;  %v705_v44 = vmax.f32 %v611_v36, 0.0  ;;  %v706_v53 = vmax.f32 %v616_v48, 0.0 }
  0xed   : > { %v691_v58 = vmax.f32 %v541_v56, 0.0  ;;  %v1898_v59 = vpop.f32.mrb[4].mxu0  ;;  %v2261_v1 = vpop.f32.mrb[3].mxu1  ;;  %v626_v54 = vadd.f32 %v2256_v63, %v2241_v45 }
  0xee   : > { %v556_v61 = vadd.f32 %v1898_v59, %v2241_v45  ;;  %v550_v62 = vpop.f32.mrb[5].mxu0  ;;  %v621_v46 = vadd.f32 %v2241_v45, %v2261_v1 }
  0xef   : > { %v551_v0 = vadd.f32 %v2241_v45, %v550_v62  ;;  %1949 = vmatprep.mubr.msk.f32.mxu1 %vm732_vm2, %v691_v58  ;;  %2005 = vmatprep.mubr.msk.f32.mxu0 %vm732_vm2, %v691_v58  ;;  %v708_v57 = vmax.f32 %v626_v54, 0.0 }
  0xf0   : > { %1950 = vmatmul.mubr.msk.f32.gmra.mrb[18].mxu1 %vm732_vm2, %v692_v60  ;;  %2006 = vmatmul.mubr.msk.f32.gmra.mrb[18].mxu0 %vm732_vm2, %v692_v60  ;;  %v694_v4 = vmax.f32 %v556_v61, 0.0  ;;  %v2266_v7 = vpop.f32.mrb[4].mxu1  ;;  %v707_v51 = vmax.f32 %v621_v46, 0.0 }
  0xf1   : > { %v693_v2 = vmax.f32 %v551_v0, 0.0  ;;  %v1901_v3 = vpop.f32.mrb[6].mxu0  ;;  %v2271_v9 = vpop.f32.mrb[5].mxu1  ;;  %v636_v58 = vadd.f32 %v2266_v7, %v2241_v45 }
  0xf2   : > { %v566_v5 = vadd.f32 %v1901_v3, %v2241_v45  ;;  %v560_v6 = vpop.f32.mrb[7].mxu0  ;;  %v631_v52 = vadd.f32 %v2241_v45, %v2271_v9 }
  0xf3   : > { %v561_v8 = vadd.f32 %v2241_v45, %v560_v6  ;;  %1952 = vmatprep.mubr.msk.f32.mxu1 %vm732_vm2, %v693_v2  ;;  %2008 = vmatprep.mubr.msk.f32.mxu0 %vm732_vm2, %v693_v2  ;;  %v710_v61 = vmax.f32 %v636_v58, 0.0 }
  0xf4   : > { %1953 = vmatmul.mubr.msk.f32.gmra.mrb[20].mxu1 %vm732_vm2, %v694_v4  ;;  %2009 = vmatmul.mubr.msk.f32.gmra.mrb[20].mxu0 %vm732_vm2, %v694_v4  ;;  %v696_v12 = vmax.f32 %v566_v5, 0.0  ;;  %v2276_v15 = vpop.f32.mrb[6].mxu1  ;;  %v709_v55 = vmax.f32 %v631_v52, 0.0 }
  0xf5   : > { %v695_v10 = vmax.f32 %v561_v8, 0.0  ;;  %v1904_v11 = vpop.f32.mrb[8].mxu0  ;;  %v640_v17 = vpop.f32.mrb[7].mxu1  ;;  %v646_v62 = vadd.f32 %v2276_v15, %v2241_v45  ;;  %v2372_v15 = vld [vmem:[%s2591_s4] ss:$0 sm:$0xff] }
  0xf6   : > { %v576_v13 = vadd.f32 %v1904_v11, %v2241_v45  ;;  %v570_v14 = vpop.f32.mrb[9].mxu0  ;;  %v641_v56 = vadd.f32 %v2241_v45, %v640_v17 }
  0xf7   : > { %v571_v16 = vadd.f32 %v2241_v45, %v570_v14  ;;  %1955 = vmatprep.mubr.msk.f32.mxu1 %vm732_vm2, %v695_v10  ;;  %2011 = vmatprep.mubr.msk.f32.mxu0 %vm732_vm2, %v695_v10  ;;  %v712_v1 = vmax.f32 %v646_v62, 0.0 }
  0xf8   : > { %1956 = vmatmul.mubr.msk.f32.gmra.mrb[22].mxu1 %vm732_vm2, %v696_v12  ;;  %2012 = vmatmul.mubr.msk.f32.gmra.mrb[22].mxu0 %vm732_vm2, %v696_v12  ;;  %v698_v20 = vmax.f32 %v576_v13, 0.0  ;;  %v2284_v23 = vpop.f32.mrb[8].mxu1  ;;  %v711_v59 = vmax.f32 %v641_v56, 0.0 }
  0xf9   : > { %v697_v18 = vmax.f32 %v571_v16, 0.0  ;;  %v1907_v19 = vpop.f32.mrb[10].mxu0  ;;  %v650_v25 = vpop.f32.mrb[9].mxu1  ;;  %v656_v2 = vadd.f32 %v2284_v23, %v2241_v45 }
  0xfa   : > { %v586_v21 = vadd.f32 %v1907_v19, %v2241_v45  ;;  %v580_v22 = vpop.f32.mrb[11].mxu0  ;;  %v651_v60 = vadd.f32 %v2241_v45, %v650_v25 }
  0xfb   : > { %v581_v24 = vadd.f32 %v2241_v45, %v580_v22  ;;  %1958 = vmatprep.mubr.msk.f32.mxu1 %vm732_vm2, %v697_v18  ;;  %2014 = vmatprep.mubr.msk.f32.mxu0 %vm732_vm2, %v697_v18  ;;  %v714_v5 = vmax.f32 %v656_v2, 0.0 }
  0xfc   : > { %1959 = vmatmul.mubr.msk.f32.gmra.mrb[24].mxu1 %vm732_vm2, %v698_v20  ;;  %2015 = vmatmul.mubr.msk.f32.gmra.mrb[24].mxu0 %vm732_vm2, %v698_v20  ;;  %v700_v28 = vmax.f32 %v586_v21, 0.0  ;;  %v2292_v31 = vpop.f32.mrb[10].mxu1  ;;  %v713_v63 = vmax.f32 %v651_v60, 0.0 }
  0xfd   : > { %v699_v26 = vmax.f32 %v581_v24, 0.0  ;;  %v1910_v27 = vpop.f32.mrb[12].mxu0  ;;  %v660_v33 = vpop.f32.mrb[11].mxu1  ;;  %v666_v6 = vadd.f32 %v2292_v31, %v2241_v45 }
  0xfe   : > { %v596_v29 = vadd.f32 %v1910_v27, %v2241_v45  ;;  %v590_v30 = vpop.f32.mrb[13].mxu0  ;;  %v661_v0 = vadd.f32 %v2241_v45, %v660_v33 }
  0xff   : > { %v591_v32 = vadd.f32 %v2241_v45, %v590_v30  ;;  %1961 = vmatprep.mubr.msk.f32.mxu1 %vm732_vm2, %v699_v26  ;;  %2017 = vmatprep.mubr.msk.f32.mxu0 %vm732_vm2, %v699_v26  ;;  %v716_v9 = vmax.f32 %v666_v6, 0.0 }
 0x100   : > { %1962 = vmatmul.mubr.msk.f32.gmra.mrb[26].mxu1 %vm732_vm2, %v700_v28  ;;  %2018 = vmatmul.mubr.msk.f32.gmra.mrb[26].mxu0 %vm732_vm2, %v700_v28  ;;  %v702_v37 = vmax.f32 %v596_v29, 0.0  ;;  %v2302_v40 = vpop.f32.mrb[12].mxu1  ;;  %v715_v3 = vmax.f32 %v661_v0, 0.0 }
 0x101   : > { %v701_v34 = vmax.f32 %v591_v32, 0.0  ;;  %v1913_v35 = vpop.f32.mrb[14].mxu0  ;;  %v670_v42 = vpop.f32.mrb[13].mxu1  ;;  %v676_v10 = vadd.f32 %v2302_v40, %v2241_v45 }
 0x102   : > { %v606_v38 = vadd.f32 %v1913_v35, %v2241_v45  ;;  %v600_v39 = vpop.f32.mrb[15].mxu0  ;;  %v671_v4 = vadd.f32 %v2241_v45, %v670_v42 }
 0x103   : > { %v601_v41 = vadd.f32 %v2241_v45, %v600_v39  ;;  %1964 = vmatprep.mubr.msk.f32.mxu1 %vm732_vm2, %v701_v34  ;;  %2020 = vmatprep.mubr.msk.f32.mxu0 %vm732_vm2, %v701_v34  ;;  %v718_v12 = vmax.f32 %v676_v10, 0.0 }
 0x104   : > { %1965 = vmatmul.mubr.msk.f32.gmra.mrb[28].mxu1 %vm732_vm2, %v702_v37  ;;  %2021 = vmatmul.mubr.msk.f32.gmra.mrb[28].mxu0 %vm732_vm2, %v702_v37  ;;  %v704_v47 = vmax.f32 %v606_v38, 0.0  ;;  %v1937_v49 = vpop.f32.mrb[14].mxu1  ;;  %v717_v7 = vmax.f32 %v671_v4, 0.0 }
 0x105   : > { %v703_v43 = vmax.f32 %v601_v41, 0.0  ;;  %v680_v50 = vpop.f32.mrb[15].mxu1  ;;  %v686_v13 = vadd.f32 %v1937_v49, %v2241_v45 }
 0x106   : > { %v681_v8 = vadd.f32 %v2241_v45, %v680_v50  ;;  %v2377_v45 = vld [vmem:[%s2593_s6] ss:$0 sm:$0xff] }
 0x107   : > { %1967 = vmatprep.mubr.msk.f32.mxu1 %vm732_vm2, %v703_v43  ;;  %2023 = vmatprep.mubr.msk.f32.mxu0 %vm732_vm2, %v703_v43  ;;  %v720_v14 = vmax.f32 %v686_v13, 0.0 }
 0x108   : > { %1968 = vmatmul.mubr.msk.f32.gmra.mrb[30].mxu1 %vm732_vm2, %v704_v47  ;;  %2024 = vmatmul.mubr.msk.f32.gmra.mrb[30].mxu0 %vm732_vm2, %v704_v47  ;;  %v719_v11 = vmax.f32 %v681_v8, 0.0 }
 0x109   : > { %1970 = vmatprep.mubr.msk.f32.mxu1 %vm732_vm2, %v705_v44  ;;  %2026 = vmatprep.mubr.msk.f32.mxu0 %vm732_vm2, %v705_v44 }
 0x10c   : > { %1971 = vmatmul.mubr.msk.f32.gmra.mrb[32].mxu1 %vm732_vm2, %v706_v53  ;;  %2027 = vmatmul.mubr.msk.f32.gmra.mrb[32].mxu0 %vm732_vm2, %v706_v53 }
 0x10d   : > { %1973 = vmatprep.mubr.msk.f32.mxu1 %vm732_vm2, %v707_v51  ;;  %2029 = vmatprep.mubr.msk.f32.mxu0 %vm732_vm2, %v707_v51 }
 0x110   : > { %1974 = vmatmul.mubr.msk.f32.gmra.mrb[34].mxu1 %vm732_vm2, %v708_v57  ;;  %2030 = vmatmul.mubr.msk.f32.gmra.mrb[34].mxu0 %vm732_vm2, %v708_v57 }
 0x111   : > { %1976 = vmatprep.mubr.msk.f32.mxu1 %vm732_vm2, %v709_v55  ;;  %2032 = vmatprep.mubr.msk.f32.mxu0 %vm732_vm2, %v709_v55 }
 0x114   : > { %1977 = vmatmul.mubr.msk.f32.gmra.mrb[36].mxu1 %vm732_vm2, %v710_v61  ;;  %2033 = vmatmul.mubr.msk.f32.gmra.mrb[36].mxu0 %vm732_vm2, %v710_v61 }
 0x115   : > { %1979 = vmatprep.mubr.msk.f32.mxu1 %vm732_vm2, %v711_v59  ;;  %2035 = vmatprep.mubr.msk.f32.mxu0 %vm732_vm2, %v711_v59 }
 0x118   : > { %1980 = vmatmul.mubr.msk.f32.gmra.mrb[38].mxu1 %vm732_vm2, %v712_v1  ;;  %2036 = vmatmul.mubr.msk.f32.gmra.mrb[38].mxu0 %vm732_vm2, %v712_v1 }
 0x119   : > { %1982 = vmatprep.mubr.msk.f32.mxu1 %vm732_vm2, %v713_v63  ;;  %2038 = vmatprep.mubr.msk.f32.mxu0 %vm732_vm2, %v713_v63 }
 0x11c   : > { %1983 = vmatmul.mubr.msk.f32.gmra.mrb[40].mxu1 %vm732_vm2, %v714_v5  ;;  %2039 = vmatmul.mubr.msk.f32.gmra.mrb[40].mxu0 %vm732_vm2, %v714_v5 }
 0x11d   : > { %1985 = vmatprep.mubr.msk.f32.mxu1 %vm732_vm2, %v715_v3  ;;  %2041 = vmatprep.mubr.msk.f32.mxu0 %vm732_vm2, %v715_v3 }
 0x120   : > { %1986 = vmatmul.mubr.msk.f32.gmra.mrb[42].mxu1 %vm732_vm2, %v716_v9  ;;  %2042 = vmatmul.mubr.msk.f32.gmra.mrb[42].mxu0 %vm732_vm2, %v716_v9 }
 0x121   : > { %1988 = vmatprep.mubr.msk.f32.mxu1 %vm732_vm2, %v717_v7  ;;  %2044 = vmatprep.mubr.msk.f32.mxu0 %vm732_vm2, %v717_v7 }
 0x124   : > { %1989 = vmatmul.mubr.msk.f32.gmra.mrb[44].mxu1 %vm732_vm2, %v718_v12  ;;  %2045 = vmatmul.mubr.msk.f32.gmra.mrb[44].mxu0 %vm732_vm2, %v718_v12 }
 0x125   : > { %1991 = vmatprep.mubr.msk.f32.mxu1 %vm732_vm2, %v719_v11  ;;  %2047 = vmatprep.mubr.msk.f32.mxu0 %vm732_vm2, %v719_v11 }
 0x128   : > { %1992 = vmatmul.mubr.msk.f32.gmra.mrb[46].mxu1 %vm732_vm2, %v720_v14  ;;  %2048 = vmatmul.mubr.msk.f32.gmra.mrb[46].mxu0 %vm732_vm2, %v720_v14 }
 0x1bf   : > { %v1948_v16 = vpop.f32.mrb[16].mxu1  ;;  %v2004_v17 = vpop.f32.mrb[16].mxu0 }
 0x1c0   : > { %v901_v18 = vadd.f32 %v1948_v16, %v2372_v15  ;;  %v1330_v19 = vadd.f32 %v2004_v17, %v2377_v45  ;;  %v895_v20 = vpop.f32.mrb[17].mxu1  ;;  %v1324_v21 = vpop.f32.mrb[17].mxu0 }
 0x1c1   : > { %v896_v22 = vadd.f32 %v2372_v15, %v895_v20  ;;  %v1325_v23 = vadd.f32 %v2377_v45, %v1324_v21 }
 0x1c2   : > { %v1055_v24 = vmax.f32 %v901_v18, 0.0  ;;  %1485 = vst.msk [vmem:[%s2384_s18 + $0x8] sm:$0xff] %vm1483_vm3, %v1330_v19 }
 0x1c3   : > { %v1054_v25 = vmax.f32 %v896_v22, 0.0  ;;  %1484 = vst.msk [vmem:[%s2384_s18] sm:$0xff] %vm1483_vm3, %v1325_v23  ;;  %v1951_v26 = vpop.f32.mrb[18].mxu1  ;;  %v2007_v27 = vpop.f32.mrb[18].mxu0 }
 0x1c4   : > { %v1752_v28 = vpack.c.bf16 %v1055_v24, %v1055_v24  ;;  %v911_v29 = vadd.f32 %v1951_v26, %v2372_v15  ;;  %v1340_v30 = vadd.f32 %v2007_v27, %v2377_v45  ;;  %v905_v31 = vpop.f32.mrb[19].mxu1  ;;  %v1334_v32 = vpop.f32.mrb[19].mxu0 }
 0x1c5   : > { %v1751_v33 = vpack.c.bf16 %v1054_v25, %v1054_v25  ;;  %v906_v34 = vadd.f32 %v2372_v15, %v905_v31  ;;  %v1335_v35 = vadd.f32 %v2377_v45, %v1334_v32 }
 0x1c6   : > { %1216 = vst.msk [vmem:[%s2396_s22 + $0x4] sm:$0xf] %vm1214_vm4, %v1752_v28  ;;  %v1057_v36 = vmax.f32 %v911_v29, 0.0 }
 0x1c7   : > { %1487 = vst.msk [vmem:[%s2384_s18 + $0x18] sm:$0xff] %vm1483_vm3, %v1340_v30  ;;  %v1056_v37 = vmax.f32 %v906_v34, 0.0  ;;  %1486 = vst.msk [vmem:[%s2384_s18 + $0x10] sm:$0xff] %vm1483_vm3, %v1335_v35  ;;  %v1954_v38 = vpop.f32.mrb[20].mxu1  ;;  %v2010_v39 = vpop.f32.mrb[20].mxu0 }
 0x1c8   : > { %1215 = vst.msk [vmem:[%s2396_s22] sm:$0xf] %vm1214_vm4, %v1751_v33  ;;  %v1754_v40 = vpack.c.bf16 %v1057_v36, %v1057_v36  ;;  %v921_v41 = vadd.f32 %v1954_v38, %v2372_v15  ;;  %v1350_v42 = vadd.f32 %v2010_v39, %v2377_v45  ;;  %v915_v43 = vpop.f32.mrb[21].mxu1  ;;  %v1344_v44 = vpop.f32.mrb[21].mxu0 }
 0x1c9   : > { %v1753_v46 = vpack.c.bf16 %v1056_v37, %v1056_v37  ;;  %v916_v47 = vadd.f32 %v2372_v15, %v915_v43  ;;  %v1345_v48 = vadd.f32 %v2377_v45, %v1344_v44 }
 0x1ca   : > { %1218 = vst.msk [vmem:[%s2396_s22 + $0xc] sm:$0xf] %vm1214_vm4, %v1754_v40  ;;  %v1059_v49 = vmax.f32 %v921_v41, 0.0 }
 0x1cb   : > { %1489 = vst.msk [vmem:[%s2384_s18 + $0x28] sm:$0xff] %vm1483_vm3, %v1350_v42  ;;  %v1058_v50 = vmax.f32 %v916_v47, 0.0  ;;  %1488 = vst.msk [vmem:[%s2384_s18 + $0x20] sm:$0xff] %vm1483_vm3, %v1345_v48  ;;  %v1957_v51 = vpop.f32.mrb[22].mxu1  ;;  %v2013_v52 = vpop.f32.mrb[22].mxu0 }
 0x1cc   : > { %1217 = vst.msk [vmem:[%s2396_s22 + $0x8] sm:$0xf] %vm1214_vm4, %v1753_v46  ;;  %v1756_v53 = vpack.c.bf16 %v1059_v49, %v1059_v49  ;;  %v931_v54 = vadd.f32 %v1957_v51, %v2372_v15  ;;  %v1360_v55 = vadd.f32 %v2013_v52, %v2377_v45  ;;  %v925_v56 = vpop.f32.mrb[23].mxu1  ;;  %v1354_v57 = vpop.f32.mrb[23].mxu0 }
 0x1cd   : > { %v1755_v58 = vpack.c.bf16 %v1058_v50, %v1058_v50  ;;  %v926_v59 = vadd.f32 %v2372_v15, %v925_v56  ;;  %v1355_v60 = vadd.f32 %v2377_v45, %v1354_v57 }
 0x1ce   : > { %1220 = vst.msk [vmem:[%s2396_s22 + $0x14] sm:$0xf] %vm1214_vm4, %v1756_v53  ;;  %v1061_v61 = vmax.f32 %v931_v54, 0.0 }
 0x1cf   : > { %1491 = vst.msk [vmem:[%s2384_s18 + $0x38] sm:$0xff] %vm1483_vm3, %v1360_v55  ;;  %v1060_v62 = vmax.f32 %v926_v59, 0.0  ;;  %1490 = vst.msk [vmem:[%s2384_s18 + $0x30] sm:$0xff] %vm1483_vm3, %v1355_v60  ;;  %v1960_v63 = vpop.f32.mrb[24].mxu1  ;;  %v2016_v0 = vpop.f32.mrb[24].mxu0 }
 0x1d0   : > { %1219 = vst.msk [vmem:[%s2396_s22 + $0x10] sm:$0xf] %vm1214_vm4, %v1755_v58  ;;  %v1758_v1 = vpack.c.bf16 %v1061_v61, %v1061_v61  ;;  %v941_v2 = vadd.f32 %v1960_v63, %v2372_v15  ;;  %v1370_v3 = vadd.f32 %v2016_v0, %v2377_v45  ;;  %v935_v4 = vpop.f32.mrb[25].mxu1  ;;  %v1364_v5 = vpop.f32.mrb[25].mxu0 }
 0x1d1   : > { %v1757_v6 = vpack.c.bf16 %v1060_v62, %v1060_v62  ;;  %v936_v7 = vadd.f32 %v2372_v15, %v935_v4  ;;  %v1365_v8 = vadd.f32 %v2377_v45, %v1364_v5 }
 0x1d2   : > { %1222 = vst.msk [vmem:[%s2396_s22 + $0x1c] sm:$0xf] %vm1214_vm4, %v1758_v1  ;;  %v1063_v9 = vmax.f32 %v941_v2, 0.0 }
 0x1d3   : > { %1493 = vst.msk [vmem:[%s2384_s18 + $0x48] sm:$0xff] %vm1483_vm3, %v1370_v3  ;;  %v1062_v10 = vmax.f32 %v936_v7, 0.0  ;;  %1492 = vst.msk [vmem:[%s2384_s18 + $0x40] sm:$0xff] %vm1483_vm3, %v1365_v8  ;;  %v1963_v11 = vpop.f32.mrb[26].mxu1  ;;  %v2019_v12 = vpop.f32.mrb[26].mxu0 }
 0x1d4   : > { %1221 = vst.msk [vmem:[%s2396_s22 + $0x18] sm:$0xf] %vm1214_vm4, %v1757_v6  ;;  %v1760_v13 = vpack.c.bf16 %v1063_v9, %v1063_v9  ;;  %v951_v14 = vadd.f32 %v1963_v11, %v2372_v15  ;;  %v1380_v16 = vadd.f32 %v2019_v12, %v2377_v45  ;;  %v945_v17 = vpop.f32.mrb[27].mxu1  ;;  %v1374_v18 = vpop.f32.mrb[27].mxu0 }
 0x1d5   : > { %v1759_v19 = vpack.c.bf16 %v1062_v10, %v1062_v10  ;;  %v946_v20 = vadd.f32 %v2372_v15, %v945_v17  ;;  %v1375_v21 = vadd.f32 %v2377_v45, %v1374_v18 }
 0x1d6   : > { %1224 = vst.msk [vmem:[%s2396_s22 + $0x24] sm:$0xf] %vm1214_vm4, %v1760_v13  ;;  %v1065_v22 = vmax.f32 %v951_v14, 0.0 }
 0x1d7   : > { %1495 = vst.msk [vmem:[%s2384_s18 + $0x58] sm:$0xff] %vm1483_vm3, %v1380_v16  ;;  %v1064_v23 = vmax.f32 %v946_v20, 0.0  ;;  %1494 = vst.msk [vmem:[%s2384_s18 + $0x50] sm:$0xff] %vm1483_vm3, %v1375_v21  ;;  %v1966_v24 = vpop.f32.mrb[28].mxu1  ;;  %v2022_v25 = vpop.f32.mrb[28].mxu0 }
 0x1d8   : > { %1223 = vst.msk [vmem:[%s2396_s22 + $0x20] sm:$0xf] %vm1214_vm4, %v1759_v19  ;;  %v1762_v26 = vpack.c.bf16 %v1065_v22, %v1065_v22  ;;  %v961_v27 = vadd.f32 %v1966_v24, %v2372_v15  ;;  %v1390_v28 = vadd.f32 %v2022_v25, %v2377_v45  ;;  %v955_v29 = vpop.f32.mrb[29].mxu1  ;;  %v1384_v30 = vpop.f32.mrb[29].mxu0 }
 0x1d9   : > { %v1761_v31 = vpack.c.bf16 %v1064_v23, %v1064_v23  ;;  %v956_v32 = vadd.f32 %v2372_v15, %v955_v29  ;;  %v1385_v33 = vadd.f32 %v2377_v45, %v1384_v30 }
 0x1da   : > { %1226 = vst.msk [vmem:[%s2396_s22 + $0x2c] sm:$0xf] %vm1214_vm4, %v1762_v26  ;;  %v1067_v34 = vmax.f32 %v961_v27, 0.0 }
 0x1db   : > { %1497 = vst.msk [vmem:[%s2384_s18 + $0x68] sm:$0xff] %vm1483_vm3, %v1390_v28  ;;  %v1066_v35 = vmax.f32 %v956_v32, 0.0  ;;  %1496 = vst.msk [vmem:[%s2384_s18 + $0x60] sm:$0xff] %vm1483_vm3, %v1385_v33  ;;  %v1969_v36 = vpop.f32.mrb[30].mxu1  ;;  %v2025_v37 = vpop.f32.mrb[30].mxu0 }
 0x1dc   : > { %1225 = vst.msk [vmem:[%s2396_s22 + $0x28] sm:$0xf] %vm1214_vm4, %v1761_v31  ;;  %v1764_v38 = vpack.c.bf16 %v1067_v34, %v1067_v34  ;;  %v971_v39 = vadd.f32 %v1969_v36, %v2372_v15  ;;  %v1400_v40 = vadd.f32 %v2025_v37, %v2377_v45  ;;  %v965_v41 = vpop.f32.mrb[31].mxu1  ;;  %v1394_v42 = vpop.f32.mrb[31].mxu0 }
 0x1dd   : > { %v1763_v43 = vpack.c.bf16 %v1066_v35, %v1066_v35  ;;  %v966_v44 = vadd.f32 %v2372_v15, %v965_v41  ;;  %v1395_v46 = vadd.f32 %v2377_v45, %v1394_v42 }
 0x1de   : > { %1228 = vst.msk [vmem:[%s2396_s22 + $0x34] sm:$0xf] %vm1214_vm4, %v1764_v38  ;;  %v1069_v47 = vmax.f32 %v971_v39, 0.0 }
 0x1df   : > { %1499 = vst.msk [vmem:[%s2384_s18 + $0x78] sm:$0xff] %vm1483_vm3, %v1400_v40  ;;  %v1068_v48 = vmax.f32 %v966_v44, 0.0  ;;  %1498 = vst.msk [vmem:[%s2384_s18 + $0x70] sm:$0xff] %vm1483_vm3, %v1395_v46  ;;  %v1972_v49 = vpop.f32.mrb[32].mxu1  ;;  %v2028_v50 = vpop.f32.mrb[32].mxu0 }
 0x1e0   : > { %1227 = vst.msk [vmem:[%s2396_s22 + $0x30] sm:$0xf] %vm1214_vm4, %v1763_v43  ;;  %v1766_v51 = vpack.c.bf16 %v1069_v47, %v1069_v47  ;;  %v981_v52 = vadd.f32 %v1972_v49, %v2372_v15  ;;  %v1410_v53 = vadd.f32 %v2028_v50, %v2377_v45  ;;  %v975_v54 = vpop.f32.mrb[33].mxu1  ;;  %v1404_v55 = vpop.f32.mrb[33].mxu0 }
 0x1e1   : > { %v1765_v56 = vpack.c.bf16 %v1068_v48, %v1068_v48  ;;  %v976_v57 = vadd.f32 %v2372_v15, %v975_v54  ;;  %v1405_v58 = vadd.f32 %v2377_v45, %v1404_v55 }
 0x1e2   : > { %1230 = vst.msk [vmem:[%s2396_s22 + $0x3c] sm:$0xf] %vm1214_vm4, %v1766_v51  ;;  %v1071_v59 = vmax.f32 %v981_v52, 0.0 }
 0x1e3   : > { %1501 = vst.msk [vmem:[%s2384_s18 + $0x88] sm:$0xff] %vm1483_vm3, %v1410_v53  ;;  %v1070_v60 = vmax.f32 %v976_v57, 0.0  ;;  %1500 = vst.msk [vmem:[%s2384_s18 + $0x80] sm:$0xff] %vm1483_vm3, %v1405_v58  ;;  %v1975_v61 = vpop.f32.mrb[34].mxu1  ;;  %v2031_v62 = vpop.f32.mrb[34].mxu0 }
 0x1e4   : > { %1229 = vst.msk [vmem:[%s2396_s22 + $0x38] sm:$0xf] %vm1214_vm4, %v1765_v56  ;;  %v1768_v63 = vpack.c.bf16 %v1071_v59, %v1071_v59  ;;  %v991_v0 = vadd.f32 %v1975_v61, %v2372_v15  ;;  %v1420_v1 = vadd.f32 %v2031_v62, %v2377_v45  ;;  %v985_v2 = vpop.f32.mrb[35].mxu1  ;;  %v1414_v3 = vpop.f32.mrb[35].mxu0 }
 0x1e5   : > { %v1767_v4 = vpack.c.bf16 %v1070_v60, %v1070_v60  ;;  %v986_v5 = vadd.f32 %v2372_v15, %v985_v2  ;;  %v1415_v6 = vadd.f32 %v2377_v45, %v1414_v3 }
 0x1e6   : > { %1232 = vst.msk [vmem:[%s2396_s22 + $0x44] sm:$0xf] %vm1214_vm4, %v1768_v63  ;;  %v1073_v7 = vmax.f32 %v991_v0, 0.0 }
 0x1e7   : > { %1503 = vst.msk [vmem:[%s2384_s18 + $0x98] sm:$0xff] %vm1483_vm3, %v1420_v1  ;;  %v1072_v8 = vmax.f32 %v986_v5, 0.0  ;;  %1502 = vst.msk [vmem:[%s2384_s18 + $0x90] sm:$0xff] %vm1483_vm3, %v1415_v6  ;;  %v1978_v9 = vpop.f32.mrb[36].mxu1  ;;  %v2034_v10 = vpop.f32.mrb[36].mxu0 }
 0x1e8   : > { %1231 = vst.msk [vmem:[%s2396_s22 + $0x40] sm:$0xf] %vm1214_vm4, %v1767_v4  ;;  %v1770_v11 = vpack.c.bf16 %v1073_v7, %v1073_v7  ;;  %v1001_v12 = vadd.f32 %v1978_v9, %v2372_v15  ;;  %v1430_v13 = vadd.f32 %v2034_v10, %v2377_v45  ;;  %v995_v14 = vpop.f32.mrb[37].mxu1  ;;  %v1424_v16 = vpop.f32.mrb[37].mxu0 }
 0x1e9   : > { %v1769_v17 = vpack.c.bf16 %v1072_v8, %v1072_v8  ;;  %v996_v18 = vadd.f32 %v2372_v15, %v995_v14  ;;  %v1425_v19 = vadd.f32 %v2377_v45, %v1424_v16 }
 0x1ea   : > { %1234 = vst.msk [vmem:[%s2396_s22 + $0x4c] sm:$0xf] %vm1214_vm4, %v1770_v11  ;;  %v1075_v20 = vmax.f32 %v1001_v12, 0.0 }
 0x1eb   : > { %1505 = vst.msk [vmem:[%s2384_s18 + $0xa8] sm:$0xff] %vm1483_vm3, %v1430_v13  ;;  %v1074_v21 = vmax.f32 %v996_v18, 0.0  ;;  %1504 = vst.msk [vmem:[%s2384_s18 + $0xa0] sm:$0xff] %vm1483_vm3, %v1425_v19  ;;  %v1981_v22 = vpop.f32.mrb[38].mxu1  ;;  %v2037_v23 = vpop.f32.mrb[38].mxu0 }
 0x1ec   : > { %1233 = vst.msk [vmem:[%s2396_s22 + $0x48] sm:$0xf] %vm1214_vm4, %v1769_v17  ;;  %v1772_v24 = vpack.c.bf16 %v1075_v20, %v1075_v20  ;;  %v1011_v25 = vadd.f32 %v1981_v22, %v2372_v15  ;;  %v1440_v26 = vadd.f32 %v2037_v23, %v2377_v45  ;;  %v1005_v27 = vpop.f32.mrb[39].mxu1  ;;  %v1434_v28 = vpop.f32.mrb[39].mxu0 }
 0x1ed   : > { %v1771_v29 = vpack.c.bf16 %v1074_v21, %v1074_v21  ;;  %v1006_v30 = vadd.f32 %v2372_v15, %v1005_v27  ;;  %v1435_v31 = vadd.f32 %v2377_v45, %v1434_v28 }
 0x1ee   : > { %1236 = vst.msk [vmem:[%s2396_s22 + $0x54] sm:$0xf] %vm1214_vm4, %v1772_v24  ;;  %v1077_v32 = vmax.f32 %v1011_v25, 0.0 }
 0x1ef   : > { %1507 = vst.msk [vmem:[%s2384_s18 + $0xb8] sm:$0xff] %vm1483_vm3, %v1440_v26  ;;  %v1076_v33 = vmax.f32 %v1006_v30, 0.0  ;;  %1506 = vst.msk [vmem:[%s2384_s18 + $0xb0] sm:$0xff] %vm1483_vm3, %v1435_v31  ;;  %v1984_v34 = vpop.f32.mrb[40].mxu1  ;;  %v2040_v35 = vpop.f32.mrb[40].mxu0 }
 0x1f0   : > { %1235 = vst.msk [vmem:[%s2396_s22 + $0x50] sm:$0xf] %vm1214_vm4, %v1771_v29  ;;  %v1774_v36 = vpack.c.bf16 %v1077_v32, %v1077_v32  ;;  %v1021_v37 = vadd.f32 %v1984_v34, %v2372_v15  ;;  %v1450_v38 = vadd.f32 %v2040_v35, %v2377_v45  ;;  %v1015_v39 = vpop.f32.mrb[41].mxu1  ;;  %v1444_v40 = vpop.f32.mrb[41].mxu0 }
 0x1f1   : > { %v1773_v41 = vpack.c.bf16 %v1076_v33, %v1076_v33  ;;  %v1016_v42 = vadd.f32 %v2372_v15, %v1015_v39  ;;  %v1445_v43 = vadd.f32 %v2377_v45, %v1444_v40 }
 0x1f2   : > { %1238 = vst.msk [vmem:[%s2396_s22 + $0x5c] sm:$0xf] %vm1214_vm4, %v1774_v36  ;;  %v1079_v44 = vmax.f32 %v1021_v37, 0.0 }
 0x1f3   : > { %1509 = vst.msk [vmem:[%s2384_s18 + $0xc8] sm:$0xff] %vm1483_vm3, %v1450_v38  ;;  %v1078_v46 = vmax.f32 %v1016_v42, 0.0  ;;  %1508 = vst.msk [vmem:[%s2384_s18 + $0xc0] sm:$0xff] %vm1483_vm3, %v1445_v43  ;;  %v1987_v47 = vpop.f32.mrb[42].mxu1  ;;  %v2043_v48 = vpop.f32.mrb[42].mxu0 }
 0x1f4   : > { %1237 = vst.msk [vmem:[%s2396_s22 + $0x58] sm:$0xf] %vm1214_vm4, %v1773_v41  ;;  %v1776_v49 = vpack.c.bf16 %v1079_v44, %v1079_v44  ;;  %v1031_v50 = vadd.f32 %v1987_v47, %v2372_v15  ;;  %v1460_v51 = vadd.f32 %v2043_v48, %v2377_v45  ;;  %v1025_v52 = vpop.f32.mrb[43].mxu1  ;;  %v1454_v53 = vpop.f32.mrb[43].mxu0 }
 0x1f5   : > { %v1775_v54 = vpack.c.bf16 %v1078_v46, %v1078_v46  ;;  %v1026_v55 = vadd.f32 %v2372_v15, %v1025_v52  ;;  %v1455_v56 = vadd.f32 %v2377_v45, %v1454_v53 }
 0x1f6   : > { %1240 = vst.msk [vmem:[%s2396_s22 + $0x64] sm:$0xf] %vm1214_vm4, %v1776_v49  ;;  %v1081_v57 = vmax.f32 %v1031_v50, 0.0 }
 0x1f7   : > { %1511 = vst.msk [vmem:[%s2384_s18 + $0xd8] sm:$0xff] %vm1483_vm3, %v1460_v51  ;;  %v1080_v58 = vmax.f32 %v1026_v55, 0.0  ;;  %1510 = vst.msk [vmem:[%s2384_s18 + $0xd0] sm:$0xff] %vm1483_vm3, %v1455_v56  ;;  %v1990_v59 = vpop.f32.mrb[44].mxu1  ;;  %v2046_v60 = vpop.f32.mrb[44].mxu0 }
 0x1f8   : > { %1239 = vst.msk [vmem:[%s2396_s22 + $0x60] sm:$0xf] %vm1214_vm4, %v1775_v54  ;;  %v1778_v61 = vpack.c.bf16 %v1081_v57, %v1081_v57  ;;  %v1041_v62 = vadd.f32 %v1990_v59, %v2372_v15  ;;  %v1470_v63 = vadd.f32 %v2046_v60, %v2377_v45  ;;  %v1035_v0 = vpop.f32.mrb[45].mxu1  ;;  %v1464_v1 = vpop.f32.mrb[45].mxu0 }
 0x1f9   : > { %v1777_v2 = vpack.c.bf16 %v1080_v58, %v1080_v58  ;;  %v1036_v3 = vadd.f32 %v2372_v15, %v1035_v0  ;;  %v1465_v4 = vadd.f32 %v2377_v45, %v1464_v1 }
 0x1fa   : > { %1242 = vst.msk [vmem:[%s2396_s22 + $0x6c] sm:$0xf] %vm1214_vm4, %v1778_v61  ;;  %v1083_v5 = vmax.f32 %v1041_v62, 0.0 }
 0x1fb   : > { %1513 = vst.msk [vmem:[%s2384_s18 + $0xe8] sm:$0xff] %vm1483_vm3, %v1470_v63  ;;  %v1082_v6 = vmax.f32 %v1036_v3, 0.0  ;;  %1512 = vst.msk [vmem:[%s2384_s18 + $0xe0] sm:$0xff] %vm1483_vm3, %v1465_v4  ;;  %v1993_v7 = vpop.f32.mrb[46].mxu1  ;;  %v2049_v8 = vpop.f32.mrb[46].mxu0 }
 0x1fc   : > { %1241 = vst.msk [vmem:[%s2396_s22 + $0x68] sm:$0xf] %vm1214_vm4, %v1777_v2  ;;  %v1780_v9 = vpack.c.bf16 %v1083_v5, %v1083_v5  ;;  %v1051_v10 = vadd.f32 %v1993_v7, %v2372_v15  ;;  %v1480_v11 = vadd.f32 %v2049_v8, %v2377_v45  ;;  %v1045_v12 = vpop.f32.mrb[47].mxu1  ;;  %v1474_v13 = vpop.f32.mrb[47].mxu0 }
 0x1fd   : > { %v1779_v14 = vpack.c.bf16 %v1082_v6, %v1082_v6  ;;  %v1046_v16 = vadd.f32 %v2372_v15, %v1045_v12  ;;  %v1475_v17 = vadd.f32 %v2377_v45, %v1474_v13 }
 0x1fe   : > { %1244 = vst.msk [vmem:[%s2396_s22 + $0x74] sm:$0xf] %vm1214_vm4, %v1780_v9  ;;  %v1085_v18 = vmax.f32 %v1051_v10, 0.0 }
 0x1ff   : > { %1515 = vst.msk [vmem:[%s2384_s18 + $0xf8] sm:$0xff] %vm1483_vm3, %v1480_v11  ;;  %v1084_v19 = vmax.f32 %v1046_v16, 0.0  ;;  %1514 = vst.msk [vmem:[%s2384_s18 + $0xf0] sm:$0xff] %vm1483_vm3, %v1475_v17 }
 0x200   : > { %1243 = vst.msk [vmem:[%s2396_s22 + $0x70] sm:$0xf] %vm1214_vm4, %v1779_v14  ;;  %v1782_v20 = vpack.c.bf16 %v1085_v18, %v1085_v18 }
 0x201   : > { %v1781_v21 = vpack.c.bf16 %v1084_v19, %v1084_v19 }
 0x202   : > { %1246 = vst.msk [vmem:[%s2396_s22 + $0x7c] sm:$0xf] %vm1214_vm4, %v1782_v20 }
 0x203   : > { %1245 = vst.msk [vmem:[%s2396_s22 + $0x78] sm:$0xf] %vm1214_vm4, %v1781_v21 }
 0x204 PF: > { %s19_s27 = sadd.s32 1, %s2082_s27  }
 0x205   : > { %p16_p4 = scmp.ge.s32.totalorder %s19_s27, 4  }
 0x207   :  { %18 = sbr.rel (!%p16_p4) target bundleno = 1 (0x1), region = 90 }

</bundles_post_ra>
